<compile_context>
chip_gen: v7x
topology: tpu7x:2x2x1
jax: 0.10.0
libtpu: 0.0.40
codegen_flags: <defaults>
</compile_context>

<pallas_src>
import jax
import jax.numpy as jnp
import numpy as np
from jax import lax
from jax.experimental import pallas as pl
from jax.experimental.pallas import tpu as pltpu

HIDDEN = 600                       # module constant: self.context_n = self.enc_n_out = 600
VMEM_LIMIT = 48 * 1024 * 1024      # <= v7x physical VMEM (64 MiB)


def _round_up(x, m):
    return (x + m - 1) // m * m


# ----------------------------- kernels -----------------------------

def _matmul_bias_kernel(x_ref, w_ref, b_ref, o_ref):
    """o = x @ w + b — one full-block MXU matmul (bf16 operands, f32 accumulation)."""
    x = x_ref[...].astype(w_ref.dtype)
    o_ref[...] = (jnp.dot(x, w_ref[...], preferred_element_type=jnp.float32)
                  + b_ref[...])


def _recurrence_kernel(gx_ref, gy_ref,
                       whh_e_ref, bhn_e_ref,
                       wc_d_ref, whh_d_ref, bhn_d_ref,
                       hs_ref, gc_ref):
    """Fused encoder+decoder GRU recurrence (single grid point, in-kernel time loops).

    gx_ref : (T_src, B, 3*Hp) precomputed encoder gate pre-activations
             (input-side matmul + [bir+bhr | biz+bhz | bin] already folded in).
    gy_ref : (T_dec, B, 3*Hp) precomputed decoder gate pre-activations (target part only;
             the constant context part is added once below).
    hs_ref : (T_dec, B, Hp) decoder hidden states (output projection happens outside).
    gc_ref : (B, 3*Hp) VMEM scratch holding the loop-invariant context projection.
    """
    T_src, B, _ = gx_ref.shape
    T_dec = gy_ref.shape[0]
    Hp = whh_e_ref.shape[0]

    def gru(g, h, whh_ref, bhn_ref):
        # Single fused (B,Hp)@(Hp,3Hp) hidden matmul per step (bf16 MXU, f32 accum).
        hdot = jnp.dot(h.astype(whh_ref.dtype), whh_ref[...],
                       preferred_element_type=jnp.float32)
        r = jax.nn.sigmoid(g[:, :Hp] + hdot[:, :Hp])
        z = jax.nn.sigmoid(g[:, Hp:2 * Hp] + hdot[:, Hp:2 * Hp])
        n = jnp.tanh(g[:, 2 * Hp:] + r * (hdot[:, 2 * Hp:] + bhn_ref[...]))
        return (1.0 - z) * n + z * h

    # ---- encoder: only the recurrent (h @ Whh) work is on the serial chain ----
    def enc_step(t, h):
        return gru(gx_ref[t], h, whh_e_ref, bhn_e_ref)

    h0 = jnp.zeros((B, Hp), jnp.float32)
    context = lax.fori_loop(0, T_src, enc_step, h0)       # encoder final state == context

    # ---- loop-invariant context projection: computed exactly once ----
    gc_ref[...] = jnp.dot(context.astype(wc_d_ref.dtype), wc_d_ref[...],
                          preferred_element_type=jnp.float32)

    # ---- decoder (teacher forcing): initial state == context ----
    def dec_step(t, h):
        h_new = gru(gy_ref[t] + gc_ref[...], h, whh_d_ref, bhn_d_ref)
        hs_ref[t] = h_new
        return h_new

    lax.fori_loop(0, T_dec, dec_step, context)


# ----------------------------- pallas_call wrappers -----------------------------

def _full(shape):
    n = len(shape)
    return pl.BlockSpec(shape, lambda i, _n=n: (0,) * _n)


def _matmul_bias(x, w, b):
    M = x.shape[0]
    N = w.shape[1]
    return pl.pallas_call(
        _matmul_bias_kernel,
        grid=(1,),
        in_specs=[_full(x.shape), _full(w.shape), _full(b.shape)],
        out_specs=_full((M, N)),
        out_shape=jax.ShapeDtypeStruct((M, N), jnp.float32),
        compiler_params=pltpu.CompilerParams(
            dimension_semantics=("arbitrary",),
            vmem_limit_bytes=VMEM_LIMIT),
    )(x, w, b)


def _recurrence(gx, gy, pk):
    T_dec, B, _ = gy.shape
    Hp = pk['hp']
    ws = (pk['enc_whh'], pk['enc_bhn'], pk['dec_wc'], pk['dec_whh'], pk['dec_bhn'])
    return pl.pallas_call(
        _recurrence_kernel,
        grid=(1,),
        in_specs=[_full(gx.shape), _full(gy.shape)] + [_full(w.shape) for w in ws],
        out_specs=_full((T_dec, B, Hp)),
        out_shape=jax.ShapeDtypeStruct((T_dec, B, Hp), jnp.float32),
        scratch_shapes=[pltpu.VMEM((B, 3 * Hp), jnp.float32)],
        compiler_params=pltpu.CompilerParams(
            dimension_semantics=("arbitrary",),
            vmem_limit_bytes=VMEM_LIMIT),
    )(gx, gy, *ws)


# ----------------------------- forward -----------------------------

def seq2seq_forward(packed, X, Y=None, *, bos_int=0):
    """Mirrors seq2seq.forward for the teacher-forcing (training) path.

    X: (B, max_steps_src, n_src_inp) one-hot sources.
    Y: (B, max_steps_tgt + 1, n_tgt_inp) one-hot targets starting with <bos>.
    Returns Y_hat: (B, max_steps_tgt, n_tgt_inp).
    """
    B, T_src, F_src = X.shape
    Hp, n_out = packed['hp'], packed['n_out']

    if Y is None:
        # TODO(synk): autoregressive prediction pipeline (dec_mode / dec_config branches,
        # feeding previous outputs back until <eos>) not implemented; only a single-<bos>
        # step runs through the Pallas kernels in that case.
        Y = jnp.zeros((B, 1, n_out), jnp.float32).at[:, :, bos_int].set(1.0)

    # Teacher forcing: Y holds max_steps_tgt + 1 steps starting with <bos>; drop the last.
    dec_in = Y[:, :max(Y.shape[1] - 1, 1), :]
    T_dec, F_tgt = dec_in.shape[1], dec_in.shape[2]

    # Hoisted, batched input-side gate projections (no time dependency -> one MXU call each).
    xe = jnp.transpose(X, (1, 0, 2)).reshape(T_src * B, F_src)
    gx = _matmul_bias(xe, packed['enc_wi'], packed['enc_bi']).reshape(T_src, B, 3 * Hp)
    yd = jnp.transpose(dec_in, (1, 0, 2)).reshape(T_dec * B, F_tgt)
    gy = _matmul_bias(yd, packed['dec_wi'], packed['dec_bi']).reshape(T_dec, B, 3 * Hp)

    # Fused encoder+decoder recurrence (context never leaves VMEM).
    hs = _recurrence(gx, gy, packed)                              # (T_dec, B, Hp)

    # Hoisted, batched output projection (lane-dense Hp rows, padded n_out lanes).
    logits = _matmul_bias(hs.reshape(T_dec * B, Hp), packed['wo'], packed['bo'])
    return logits[:, :n_out].reshape(T_dec, B, n_out).transpose(1, 0, 2)


# ----------------------------- parameters -----------------------------

def init_params(key, n_src_inp, n_tgt_inp, hidden=HIDDEN):
    """Unfused f32 parameters at H=600 (also used by the pure-JAX reference)."""
    bound = 1.0 / np.sqrt(hidden)
    keys = iter(jax.random.split(key, 64))

    def u(shape):
        return jax.random.uniform(next(keys), shape, jnp.float32, -bound, bound)

    enc_shapes = {
        'wxr': (n_src_inp, hidden), 'wxz': (n_src_inp, hidden), 'wxn': (n_src_inp, hidden),
        'whr': (hidden, hidden), 'whz': (hidden, hidden), 'whn': (hidden, hidden),
        'bir': (1, hidden), 'biz': (1, hidden), 'bin': (1, hidden),
        'bhr': (1, hidden), 'bhz': (1, hidden), 'bhn': (1, hidden),
    }
    dec_shapes = {
        'wyr': (n_tgt_inp, hidden), 'wyz': (n_tgt_inp, hidden), 'wyn': (n_tgt_inp, hidden),
        'wcr': (hidden, hidden), 'wcz': (hidden, hidden), 'wcn': (hidden, hidden),
        'whr': (hidden, hidden), 'whz': (hidden, hidden), 'whn': (hidden, hidden),
        'bir': (1, hidden), 'biz': (1, hidden), 'bin': (1, hidden),
        'bhr': (1, hidden), 'bhz': (1, hidden), 'bhn': (1, hidden),
        'wo': (hidden, n_tgt_inp), 'bo': (1, n_tgt_inp),
    }
    enc = {k: u(s) for k, s in enc_shapes.items()}
    dec = {k: u(s) for k, s in dec_shapes.items()}
    return {'enc': enc, 'dec': dec}


def pack_params(params, n_tgt_inp):
    """Fuse per-gate weights, fold r/z biases, pad H->multiple of 128, cast weights to bf16."""
    pe, pd = params['enc'], params['dec']
    H = pe['whr'].shape[0]
    Hp = _round_up(H, 128)
    NOp = _round_up(n_tgt_inp, 128)

    def padw(w, rows, cols):
        return jnp.pad(w, ((0, rows - w.shape[0]), (0, cols - w.shape[1])))

    def padb(b):
        return jnp.pad(b, ((0, 0), (0, Hp - b.shape[1])))

    def fuse(wr, wz, wn, rows):
        return jnp.concatenate(
            [padw(wr, rows, Hp), padw(wz, rows, Hp), padw(wn, rows, Hp)], axis=1)

    enc_wi = fuse(pe['wxr'], pe['wxz'], pe['wxn'], pe['wxr'].shape[0]).astype(jnp.bfloat16)
    enc_bi = jnp.concatenate([padb(pe['bir'] + pe['bhr']),
                              padb(pe['biz'] + pe['bhz']),
                              padb(pe['bin'])], axis=1)                     # f32 (1, 3Hp)
    enc_whh = fuse(pe['whr'], pe['whz'], pe['whn'], Hp).astype(jnp.bfloat16)
    enc_bhn = padb(pe['bhn'])                                               # f32 (1, Hp)

    dec_wi = fuse(pd['wyr'], pd['wyz'], pd['wyn'], pd['wyr'].shape[0]).astype(jnp.bfloat16)
    dec_bi = jnp.concatenate([padb(pd['bir'] + pd['bhr']),
                              padb(pd['biz'] + pd['bhz']),
                              padb(pd['bin'])], axis=1)
    dec_wc = fuse(pd['wcr'], pd['wcz'], pd['wcn'], Hp).astype(jnp.bfloat16)
    dec_whh = fuse(pd['whr'], pd['whz'], pd['whn'], Hp).astype(jnp.bfloat16)
    dec_bhn = padb(pd['bhn'])

    wo = jnp.pad(pd['wo'], ((0, Hp - H), (0, NOp - n_tgt_inp))).astype(jnp.bfloat16)
    bo = jnp.pad(pd['bo'], ((0, 0), (0, NOp - n_tgt_inp)))                  # f32 (1, NOp)

    return {
        'hp': Hp, 'n_out': n_tgt_inp,
        'enc_wi': enc_wi, 'enc_bi': enc_bi, 'enc_whh': enc_whh, 'enc_bhn': enc_bhn,
        'dec_wi': dec_wi, 'dec_bi': dec_bi, 'dec_wc': dec_wc, 'dec_whh': dec_whh,
        'dec_bhn': dec_bhn, 'wo': wo, 'bo': bo,
    }


# ----------------------------- pure-JAX reference -----------------------------

def ref_forward(params, X, Y):
    pe, pd = params['enc'], params['dec']

    def gru(h, gr_x, gz_x, gn_x, whr, whz, whn, bhr, bhz, bhn):
        r = jax.nn.sigmoid(gr_x + h @ whr + bhr)
        z = jax.nn.sigmoid(gz_x + h @ whz + bhz)
        n = jnp.tanh(gn_x + r * (h @ whn + bhn))
        return (1.0 - z) * n + z * h

    def enc_step(h, x_t):
        h_new = gru(h,
                    x_t @ pe['wxr'] + pe['bir'],
                    x_t @ pe['wxz'] + pe['biz'],
                    x_t @ pe['wxn'] + pe['bin'],
                    pe['whr'], pe['whz'], pe['whn'],
                    pe['bhr'], pe['bhz'], pe['bhn'])
        return h_new, None

    B = X.shape[0]
    h0 = jnp.zeros((B, HIDDEN), jnp.float32)
    context, _ = jax.lax.scan(enc_step, h0, jnp.transpose(X, (1, 0, 2)))

    def dec_step(h, y_t):
        h_new = gru(h,
                    y_t @ pd['wyr'] + context @ pd['wcr'] + pd['bir'],
                    y_t @ pd['wyz'] + context @ pd['wcz'] + pd['biz'],
                    y_t @ pd['wyn'] + context @ pd['wcn'] + pd['bin'],
                    pd['whr'], pd['whz'], pd['whn'],
                    pd['bhr'], pd['bhz'], pd['bhn'])
        return h_new, h_new @ pd['wo'] + pd['bo']

    dec_in = jnp.transpose(Y[:, :-1, :], (1, 0, 2))
    _, yhat = jax.lax.scan(dec_step, context, dec_in)
    return jnp.transpose(yhat, (1, 0, 2))


# ----------------------------- demo -----------------------------

if __name__ == "__main__":
    B, n_src_inp, T_src = 4, 12, 8
    n_tgt_inp, T_tgt = 10, 6
    bos_int = 0

    key = jax.random.PRNGKey(0)
    kp, kx, ky = jax.random.split(key, 3)
    params = init_params(kp, n_src_inp, n_tgt_inp)
    packed = pack_params(params, n_tgt_inp)

    # X: (B, max_steps_src, n_src_inp) one-hot sources
    src_ids = jax.random.randint(kx, (B, T_src), 0, n_src_inp)
    X = jax.nn.one_hot(src_ids, n_src_inp, dtype=jnp.float32)

    # Y: (B, max_steps_tgt + 1, n_tgt_inp) one-hot targets starting with <bos>
    tgt_ids = jax.random.randint(ky, (B, T_tgt), 0, n_tgt_inp)
    tgt_ids = jnp.concatenate(
        [jnp.full((B, 1), bos_int, tgt_ids.dtype), tgt_ids], axis=1)
    Y = jax.nn.one_hot(tgt_ids, n_tgt_inp, dtype=jnp.float32)

    y_hat = seq2seq_forward(packed, X, Y, bos_int=bos_int)
    y_hat = jax.block_until_ready(y_hat)
    assert y_hat.shape == (B, T_tgt, n_tgt_inp), y_hat.shape

    y_ref = jax.block_until_ready(ref_forward(params, X, Y))
    err = float(jnp.max(jnp.abs(y_hat - y_ref)))
    assert err < 5e-2, f"mismatch vs pure-JAX reference: max abs err = {err}"

    print("KERNEL_OK")
</pallas_src>

<mosaic_0001>
module attributes {stable_mosaic.version = 11 : i64} {
  func.func @_matmul_bias_kernel(%arg0: i32, %arg1: memref<32x12xf32, #tpu.memory_space<vmem>>, %arg2: memref<12x1920xbf16, #tpu.memory_space<vmem>>, %arg3: memref<1x1920xf32, #tpu.memory_space<vmem>>, %arg4: memref<32x1920xf32, #tpu.memory_space<vmem>>) attributes {dimension_semantics = [#tpu.dimension_semantics<arbitrary>], iteration_bounds = array<i64: 1>, scalar_prefetch = 0 : i64, scratch_operands = 0 : i64, tpu.core_type = #tpu.core_type<tc>, window_params = [{pipeline_mode = #tpu.pipeline_mode<synchronous>, transform_indices = @transform_0, window_bounds = array<i64: 32, 12>}, {pipeline_mode = #tpu.pipeline_mode<synchronous>, transform_indices = @transform_1, window_bounds = array<i64: 12, 1920>}, {pipeline_mode = #tpu.pipeline_mode<synchronous>, transform_indices = @transform_2, window_bounds = array<i64: 1, 1920>}, {pipeline_mode = #tpu.pipeline_mode<synchronous>, transform_indices = @transform_3, window_bounds = array<i64: 32, 1920>}]} {
    %c0 = arith.constant 0 : index
    %c0_0 = arith.constant 0 : index
    %0 = vector.load %arg1[%c0, %c0_0] : memref<32x12xf32, #tpu.memory_space<vmem>>, vector<32x12xf32>
    %1 = arith.truncf %0 : vector<32x12xf32> to vector<32x12xbf16>
    %c0_1 = arith.constant 0 : index
    %c0_2 = arith.constant 0 : index
    %2 = vector.load %arg2[%c0_1, %c0_2] : memref<12x1920xbf16, #tpu.memory_space<vmem>>, vector<12x1920xbf16>
    %cst = arith.constant dense<0.000000e+00> : vector<32x1920xf32>
    %3 = tpu.matmul %1, %2, %cst {dimension_numbers = #tpu.dot_dimension_numbers<[1], [0], [0], [1], [0, 0, 1, 1], [], []>} : vector<32x12xbf16>, vector<12x1920xbf16>, vector<32x1920xf32> -> vector<32x1920xf32>
    %c0_3 = arith.constant 0 : index
    %c0_4 = arith.constant 0 : index
    %4 = vector.load %arg3[%c0_3, %c0_4] : memref<1x1920xf32, #tpu.memory_space<vmem>>, vector<1x1920xf32>
    %5 = vector.broadcast %4 : vector<1x1920xf32> to vector<32x1920xf32>
    %6 = arith.addf %3, %5 : vector<32x1920xf32>
    %c0_5 = arith.constant 0 : index
    %c0_6 = arith.constant 0 : index
    %7 = vector.load %arg4[%c0_5, %c0_6] : memref<32x1920xf32, #tpu.memory_space<vmem>>, vector<32x1920xf32>
    tpu.vector_store %arg4[%c0_5, %c0_6], %6 {strides = array<i32>} : memref<32x1920xf32, #tpu.memory_space<vmem>>, vector<32x1920xf32>,
    return
  }
  func.func @transform_0(%arg0: i32) -> (i32, i32) {
    %c0_i32 = arith.constant 0 : i32
    %c0_i32_0 = arith.constant 0 : i32
    %c0_i32_1 = arith.constant 0 : i32
    return %c0_i32, %c0_i32_0 : i32, i32
  }
  func.func @transform_1(%arg0: i32) -> (i32, i32) {
    %c0_i32 = arith.constant 0 : i32
    %c0_i32_0 = arith.constant 0 : i32
    %c0_i32_1 = arith.constant 0 : i32
    return %c0_i32, %c0_i32_0 : i32, i32
  }
  func.func @transform_2(%arg0: i32) -> (i32, i32) {
    %c0_i32 = arith.constant 0 : i32
    %c0_i32_0 = arith.constant 0 : i32
    %c0_i32_1 = arith.constant 0 : i32
    return %c0_i32, %c0_i32_0 : i32, i32
  }
  func.func @transform_3(%arg0: i32) -> (i32, i32) {
    %c0_i32 = arith.constant 0 : i32
    %c0_i32_0 = arith.constant 0 : i32
    %c0_i32_1 = arith.constant 0 : i32
    return %c0_i32, %c0_i32_0 : i32, i32
  }
}

</mosaic_0001>

<bundles_post_ra>
// kernel: tpu_custom_call.1
= control target key start
LH: loop header
LB: loop body
LE: loop exit
PB: predicated region body
PF: predicated region fallthrough
CT: control target
= control target key end

     0   :  { %8 = vsyncpa [#allocation3], 0  ;;  %s1049_s0 = inlined_call_operand.vmem [shape: f32[32,12], index: 0, kind: input, shape index: {}]   ;;  %s1050_s1 = inlined_call_operand.hbm [shape: bf16[12,1920], index: 1, kind: input, shape index: {}]   ;;  %s1051_s2 = inlined_call_operand.vmem [shape: f32[1,1920], index: 2, kind: input, shape index: {}]   ;;  %s1052_s3 = inlined_call_operand.hbm [shape: f32[32,1920], index: 3, kind: output, shape index: {}]  }
   0x1   :  { %9 = vsyncpa [#allocation4], 0  ;;  %s867_s12 = smov [#allocation2]   ;;  %s819_s16 = scalar_lea.hbm %s1050_s1, 1920 }
   0x2   :  { %s17_s13 = sshll.u32 %s867_s12, 4  ;;  %p820_p0 = scmp.ne.s32.totalorder %s1050_s1, %s819_s16  ;;  %s18_s13 = int_to_ptr.vmem [resolvable:$true] %s17_s13 }
   0x3   :  { %p823_p1 = scmp.lt.u32.totalorder %s819_s16, %s1050_s1 }
   0x5   :  { %p825_p2 = pnand %p823_p1, %p820_p0 }
   0x7   :  { %828 = shalt.err (!%p825_p2)
}
   0x8   :  { %s829_s21 = scalar_lea.vmem %s18_s13, 1920  ;;  %p834_p4 = scmp.lt.s32.totalorder %s18_s13, %s18_s13 }
   0x9   :  { %p830_p3 = scmp.ne.s32.totalorder %s18_s13, %s829_s21  ;;  %p835_p5 = scmp.lt.s32.totalorder %s829_s21, %s829_s21 }
   0xb   :  { %p836_p6 = por %p835_p5, %p834_p4 }
   0xd   :  { %p837_p7 = pnand %p836_p6, %p830_p3 }
   0xf   :  { %840 = shalt.err (!%p837_p7)
}
  0x10   :  { %s868_s22 = smov 960   ;;  %s869_s23 = smov 60  }
  0x11   :  { %23 = dma.hbm_to_vmem [thread:$0]  %s1050_s1, 1920, %s18_s13, [#allocation3], %s868_s22, %s868_s22, %s869_s23  }
  0x12   :  { %863 = dma.done.wait [#allocation3], 1920  }
  0x13   :  { %864 = vsyncadd [#allocation3], 4294965376  ;;  %v870_v0 = vmov 0   ;;  %vm199_vm0 = vcmask 1045504   ;;  %v30_v3 = vld [vmem:[%s1049_s0] sm:$0xff]  ;;  %v31_v4 = vld [vmem:[%s1049_s0 + $0x8] sm:$0xff]  ;;  %v56_v30 = vlaneseq }
  0x14   :  { %277 = vmatprep.mubr.bf16.mxu0 %v870_v0  ;;  %330 = vmatprep.mubr.bf16.mxu1 %v870_v0  ;;  %v797_v1 = vld [vmem:[#allocation2 + $0x4] ss:$60 sps:$4 sm:$0x3f]   ;;  %v800_v5 = vld [vmem:[#allocation2 + $0x14] ss:$60 sps:$4 sm:$0x3f]   ;;  %v916_v7 = vpack.c.bf16 %v31_v4, %v30_v3 }
  0x15   :  { %v799_v2 = vld [vmem:[#allocation2] ss:$60 sps:$4 sm:$0x3f]   ;;  %757 = vmatprep.subr.msk.bf16.mxu0 %vm199_vm0, %v797_v1  ;;  %v802_v8 = vld [vmem:[#allocation2 + $0x10] ss:$60 sps:$4 sm:$0x3f]  }
  0x16   :  { %v201_v6 = vsel %vm199_vm0, %v799_v2, 0  ;;  %vm192_vm1 = vcmask 97280   ;;  %v803_v9 = vld [vmem:[#allocation2 + $0xc] ss:$60 sps:$4 sm:$0x3f]   ;;  %v213_v10 = vsel %vm199_vm0, %v802_v8, 0 }
  0x17   :  { %246 = vmatpush1.bf16.msra.mxu0 %v201_v6  ;;  %v805_v11 = vld [vmem:[#allocation2 + $0x8] ss:$60 sps:$4 sm:$0x3f]   ;;  %760 = vmatprep.subr.msk.bf16.mxu1 %vm199_vm0, %v803_v9  ;;  %v806_v12 = vld [vmem:[#allocation2 + $0x1c] ss:$60 sps:$4 sm:$0x3f]  }
  0x18   :  { %763 = vmatprep.subr.msk.bf16.mxu0 %vm199_vm0, %v800_v5  ;;  %v207_v13 = vsel %vm199_vm0, %v805_v11, 0  ;;  %v808_v14 = vld [vmem:[#allocation2 + $0x18] ss:$60 sps:$4 sm:$0x3f]   ;;  %v974_v31 = vshrl.u32 %v56_v30, 7  ;;  %v980_v33 = vld [vmem:[%s1051_s2] sm:$0xff] }
  0x19   :  { %299 = vmatpush1.bf16.msra.mxu1 %v207_v13  ;;  %v32_v15 = vld [vmem:[%s1049_s0 + $0x10] sm:$0xff]  ;;  %v33_v16 = vld [vmem:[%s1049_s0 + $0x18] sm:$0xff]  ;;  %v809_v17 = vld [vmem:[#allocation2 + $0x24] ss:$60 sps:$4 sm:$0x3f]   ;;  %v219_v18 = vsel %vm199_vm0, %v808_v14, 0 }
  0x1a   :  { %758 = vmatmul.mubr.msk.bf16.vlgmr.msra.gmra.mrb[0].mxu0 %vm192_vm1, %v916_v7  ;;  %766 = vmatprep.subr.msk.bf16.mxu1 %vm199_vm0, %v806_v12  ;;  %v812_v19 = vld [vmem:[#allocation2 + $0x2c] ss:$60 sps:$4 sm:$0x3f]   ;;  %v35_v20 = vpack.c.bf16 %v33_v16, %v32_v15  ;;  %v811_v21 = vld [vmem:[#allocation2 + $0x20] ss:$60 sps:$4 sm:$0x3f]  }
  0x1b   :  { %352 = vmatpush1.bf16.msra.mxu0 %v213_v10  ;;  %287 = vmatprep.mubr.bf16.mxu0 %v870_v0  ;;  %v225_v22 = vsel %vm199_vm0, %v811_v21, 0  ;;  %v814_v23 = vld [vmem:[#allocation2 + $0x28] ss:$60 sps:$4 sm:$0x3f]   ;;  %v58_v32 = vsub.s32 0, %v974_v31  ;;  %v62_v34 = vsub.s32 1, %v974_v31 }
  0x1c   :  { %769 = vmatprep.subr.msk.bf16.mxu0 %vm199_vm0, %v809_v17  ;;  %761 = vmatmul.mubr.msk.bf16.vlgmr.msra.gmra.mrb[0].mxu1 %vm192_vm1, %v916_v7  ;;  %v815_v24 = vld [vmem:[#allocation2 + $0x34] ss:$60 sps:$4 sm:$0x3f]   ;;  %v231_v25 = vsel %vm199_vm0, %v814_v23, 0  ;;  %v66_v36 = vsub.s32 2, %v974_v31  ;;  %v70_v38 = vsub.s32 3, %v974_v31 }
  0x1d   :  { %405 = vmatpush1.bf16.msra.mxu1 %v219_v18  ;;  %340 = vmatprep.mubr.bf16.mxu1 %v870_v0  ;;  %v818_v26 = vld [vmem:[#allocation2 + $0x38] ss:$60 sps:$4 sm:$0x3f]   ;;  %v817_v27 = vld [vmem:[#allocation2 + $0x30] ss:$60 sps:$4 sm:$0x3f]   ;;  %v59_v35 = vrot.slane %v980_v33, %v58_v32  ;;  %v63_v37 = vrot.slane %v980_v33, %v62_v34 }
  0x1e   :  { %772 = vmatprep.subr.msk.bf16.mxu1 %vm199_vm0, %v812_v19  ;;  %v237_v28 = vsel %vm199_vm0, %v817_v27, 0  ;;  %v243_v29 = vsel %vm199_vm0, %v818_v26, 0  ;;  %v67_v42 = vrot.slane %v980_v33, %v66_v36  ;;  %v71_v45 = vrot.slane %v980_v33, %v70_v38 }
  0x1f   :  { %v74_v60 = vsub.s32 4, %v974_v31  ;;  %v78_v63 = vsub.s32 5, %v974_v31  ;;  %v86_v11 = vsub.s32 7, %v974_v31 }
  0x21   :  { %v75_v6 = vrot.slane %v980_v33, %v74_v60  ;;  %v79_v10 = vrot.slane %v980_v33, %v78_v63  ;;  %v87_v21 = vrot.slane %v980_v33, %v86_v11 }
  0x22   :  { %759 = vmatmul.mubr.msk.bf16.gmra.mrb[4].mxu0 %vm192_vm1, %v35_v20 }
  0x23   :  { %383 = vmatprep.mubr.bf16.mxu0 %v870_v0 }
  0x24   :  { %762 = vmatmul.mubr.msk.bf16.gmra.mrb[4].mxu1 %vm192_vm1, %v35_v20 }
  0x25   :  { %436 = vmatprep.mubr.bf16.mxu1 %v870_v0 }
  0x2a   :  { %764 = vmatmul.mubr.msk.bf16.vlgmr.msra.gmra.mrb[8].mxu0 %vm192_vm1, %v916_v7 }
  0x2b   :  { %458 = vmatpush1.bf16.msra.mxu0 %v225_v22  ;;  %393 = vmatprep.mubr.bf16.mxu0 %v870_v0 }
  0x2c   :  { %775 = vmatprep.subr.msk.bf16.mxu0 %vm199_vm0, %v815_v24  ;;  %767 = vmatmul.mubr.msk.bf16.vlgmr.msra.gmra.mrb[8].mxu1 %vm192_vm1, %v916_v7 }
  0x2d   :  { %511 = vmatpush1.bf16.msra.mxu1 %v231_v25  ;;  %446 = vmatprep.mubr.bf16.mxu1 %v870_v0 }
  0x2e   :  { %789 = vmatprep.subr.msk.bf16.mxu1 %vm199_vm0, %v818_v26 }
  0x32   :  { %765 = vmatmul.mubr.msk.bf16.gmra.mrb[12].mxu0 %vm192_vm1, %v35_v20 }
  0x33   :  { %489 = vmatprep.mubr.bf16.mxu0 %v870_v0 }
  0x34   :  { %768 = vmatmul.mubr.msk.bf16.gmra.mrb[12].mxu1 %vm192_vm1, %v35_v20 }
  0x35   :  { %542 = vmatprep.mubr.bf16.mxu1 %v870_v0 }
  0x3a   :  { %770 = vmatmul.mubr.msk.bf16.vlgmr.msra.gmra.mrb[16].mxu0 %vm192_vm1, %v916_v7 }
  0x3b   :  { %564 = vmatpush1.bf16.msra.mxu0 %v237_v28  ;;  %499 = vmatprep.mubr.bf16.mxu0 %v870_v0 }
  0x3c   :  { %773 = vmatmul.mubr.msk.bf16.vlgmr.msra.gmra.mrb[16].mxu1 %vm192_vm1, %v916_v7 }
  0x3d   :  { %784 = vmatpush3.bf16.msra.mxu1 %v243_v29  ;;  %552 = vmatprep.mubr.bf16.mxu1 %v870_v0 }
  0x42   :  { %771 = vmatmul.mubr.msk.bf16.gmra.mrb[20].mxu0 %vm192_vm1, %v35_v20 }
  0x43   :  { %595 = vmatprep.mubr.bf16.mxu0 %v870_v0 }
  0x44   :  { %774 = vmatmul.mubr.msk.bf16.gmra.mrb[20].mxu1 %vm192_vm1, %v35_v20 }
  0x45   :  { %785 = vmatprep.mubr.msk.bf16.mxu1 %vm192_vm1, %v916_v7 }
  0x4a   :  { %776 = vmatmul.mubr.msk.bf16.vlgmr.msra.gmra.mrb[24].mxu0 %vm192_vm1, %v916_v7  ;;  %v82_v7 = vsub.s32 6, %v974_v31 }
  0x4b   :  { %605 = vmatprep.mubr.bf16.mxu0 %v870_v0 }
  0x4c   :  { %786 = vmatmul.mubr.msk.bf16.vlgmr.msra.gmra.mrb[24].mxu1 %vm192_vm1, %v35_v20  ;;  %v83_v18 = vrot.slane %v980_v33, %v82_v7 }
  0x52   :  { %777 = vmatmul.mubr.msk.bf16.gmra.mrb[28].mxu0 %vm192_vm1, %v35_v20 }
  0xed   :  { %v279_v39 = vpop.f32.mrb[0].mxu0 }
  0xee   :  { %v280_v40 = vadd.f32 %v279_v39, %v59_v35  ;;  %v281_v41 = vpop.f32.mrb[1].mxu0 }
  0xef   :  { %v282_v43 = vadd.f32 %v281_v41, %v63_v37  ;;  %v283_v44 = vpop.f32.mrb[2].mxu0  ;;  %v332_v49 = vpop.f32.mrb[0].mxu1 }
  0xf0   :  { %665 = vst [vmem:[#allocation5] sm:$0xff] %v280_v40  ;;  %v284_v46 = vadd.f32 %v283_v44, %v59_v35  ;;  %v285_v47 = vpop.f32.mrb[3].mxu0  ;;  %v333_v50 = vadd.f32 %v332_v49, %v67_v42  ;;  %v334_v51 = vpop.f32.mrb[1].mxu1 }
  0xf1   :  { %666 = vst [vmem:[#allocation5 + $0x8] sm:$0xff] %v282_v43  ;;  %v286_v48 = vadd.f32 %v285_v47, %v63_v37  ;;  %v335_v52 = vadd.f32 %v334_v51, %v71_v45  ;;  %v336_v53 = vpop.f32.mrb[2].mxu1  ;;  %v1014_v43 = vld [vmem:[%s1051_s2 + $0x8] sm:$0xff]  ;;  %s871_s2 = smov [#allocation5]  }
  0xf2   :  { %680 = vst [vmem:[#allocation5 + $0x78] sm:$0xff] %v284_v46  ;;  %667 = vst [vmem:[#allocation5 + $0x10] sm:$0xff] %v333_v50  ;;  %v337_v54 = vadd.f32 %v336_v53, %v67_v42  ;;  %v338_v55 = vpop.f32.mrb[3].mxu1  ;;  %v91_v50 = vrot.slane %v1014_v43, %v58_v32  ;;  %v95_v53 = vrot.slane %v1014_v43, %v62_v34  ;;  %s730_s9 = sshll.u32 %s871_s2, 4  ;;  %s731_s9 = int_to_ptr.vmem [resolvable:$true] %s730_s9 }
  0xf3   :  { %681 = vst [vmem:[#allocation5 + $0x80] sm:$0xff] %v286_v48  ;;  %668 = vst [vmem:[#allocation5 + $0x18] sm:$0xff] %v335_v52  ;;  %v339_v57 = vadd.f32 %v338_v55, %v71_v45  ;;  %v99_v32 = vrot.slane %v1014_v43, %v66_v36  ;;  %v103_v34 = vrot.slane %v1014_v43, %v70_v38  ;;  %s841_s10 = scalar_lea.vmem %s731_s9, 7680  ;;  %p846_p9 = scmp.lt.s32.totalorder %s731_s9, %s731_s9 }
  0xf4   :  { %682 = vst [vmem:[#allocation5 + $0x88] sm:$0xff] %v337_v54  ;;  %p842_p8 = scmp.ne.s32.totalorder %s731_s9, %s841_s10  ;;  %p847_p10 = scmp.lt.s32.totalorder %s841_s10, %s841_s10 }
  0xf5   :  { %v289_v56 = vpop.f32.mrb[4].mxu0  ;;  %683 = vst [vmem:[#allocation5 + $0x90] sm:$0xff] %v339_v57 }
  0xf6   :  { %v290_v58 = vadd.f32 %v289_v56, %v59_v35  ;;  %v291_v59 = vpop.f32.mrb[5].mxu0  ;;  %p848_p11 = por %p847_p10, %p846_p9 }
  0xf7   :  { %v292_v61 = vadd.f32 %v291_v59, %v63_v37  ;;  %v293_v62 = vpop.f32.mrb[6].mxu0  ;;  %v342_v3 = vpop.f32.mrb[4].mxu1 }
  0xf8   :  { %695 = vst [vmem:[#allocation5 + $0xf0] sm:$0xff] %v290_v58  ;;  %v294_v0 = vadd.f32 %v293_v62, %v59_v35  ;;  %v295_v1 = vpop.f32.mrb[7].mxu0  ;;  %v343_v4 = vadd.f32 %v342_v3, %v67_v42  ;;  %v344_v5 = vpop.f32.mrb[5].mxu1  ;;  %p849_p12 = pnand %p848_p11, %p842_p8 }
  0xf9   :  { %696 = vst [vmem:[#allocation5 + $0xf8] sm:$0xff] %v292_v61  ;;  %v296_v2 = vadd.f32 %v295_v1, %v63_v37  ;;  %v345_v8 = vadd.f32 %v344_v5, %v71_v45  ;;  %v346_v9 = vpop.f32.mrb[6].mxu1 }
  0xfa   :  { %710 = vst [vmem:[#allocation5 + $0x168] sm:$0xff] %v294_v0  ;;  %697 = vst [vmem:[#allocation5 + $0x100] sm:$0xff] %v343_v4  ;;  %v347_v12 = vadd.f32 %v346_v9, %v67_v42  ;;  %v348_v13 = vpop.f32.mrb[7].mxu1 }
  0xfb   :  { %711 = vst [vmem:[#allocation5 + $0x170] sm:$0xff] %v296_v2  ;;  %698 = vst [vmem:[#allocation5 + $0x108] sm:$0xff] %v345_v8  ;;  %v349_v15 = vadd.f32 %v348_v13, %v71_v45 }
  0xfc   :  { %712 = vst [vmem:[#allocation5 + $0x178] sm:$0xff] %v347_v12 }
  0xfd   :  { %v385_v14 = vpop.f32.mrb[8].mxu0  ;;  %713 = vst [vmem:[#allocation5 + $0x180] sm:$0xff] %v349_v15 }
  0xfe   :  { %v386_v16 = vadd.f32 %v385_v14, %v75_v6  ;;  %v387_v17 = vpop.f32.mrb[9].mxu0 }
  0xff   :  { %v388_v19 = vadd.f32 %v387_v17, %v79_v10  ;;  %v389_v20 = vpop.f32.mrb[10].mxu0  ;;  %v438_v25 = vpop.f32.mrb[8].mxu1 }
 0x100   :  { %669 = vst [vmem:[#allocation5 + $0x20] sm:$0xff] %v386_v16  ;;  %v390_v22 = vadd.f32 %v389_v20, %v75_v6  ;;  %v391_v23 = vpop.f32.mrb[11].mxu0  ;;  %v439_v26 = vadd.f32 %v438_v25, %v83_v18  ;;  %v440_v27 = vpop.f32.mrb[9].mxu1 }
 0x101   :  { %670 = vst [vmem:[#allocation5 + $0x28] sm:$0xff] %v388_v19  ;;  %v392_v24 = vadd.f32 %v391_v23, %v79_v10  ;;  %v441_v28 = vadd.f32 %v440_v27, %v87_v21  ;;  %v442_v29 = vpop.f32.mrb[10].mxu1 }
 0x102   :  { %684 = vst [vmem:[#allocation5 + $0x98] sm:$0xff] %v390_v22  ;;  %671 = vst [vmem:[#allocation5 + $0x30] sm:$0xff] %v439_v26  ;;  %v443_v30 = vadd.f32 %v442_v29, %v83_v18  ;;  %v444_v35 = vpop.f32.mrb[11].mxu1 }
 0x103   :  { %685 = vst [vmem:[#allocation5 + $0xa0] sm:$0xff] %v392_v24  ;;  %672 = vst [vmem:[#allocation5 + $0x38] sm:$0xff] %v441_v28  ;;  %v445_v39 = vadd.f32 %v444_v35, %v87_v21  ;;  %v111_v24 = vrot.slane %v1014_v43, %v78_v63 }
 0x104   :  { %686 = vst [vmem:[#allocation5 + $0xa8] sm:$0xff] %v443_v30 }
 0x105   :  { %v395_v37 = vpop.f32.mrb[12].mxu0  ;;  %687 = vst [vmem:[#allocation5 + $0xb0] sm:$0xff] %v445_v39 }
 0x106   :  { %v396_v40 = vadd.f32 %v395_v37, %v75_v6  ;;  %v397_v33 = vpop.f32.mrb[13].mxu0 }
 0x107   :  { %v398_v41 = vadd.f32 %v397_v33, %v79_v10  ;;  %v399_v42 = vpop.f32.mrb[14].mxu0  ;;  %v448_v47 = vpop.f32.mrb[12].mxu1 }
 0x108   :  { %699 = vst [vmem:[#allocation5 + $0x110] sm:$0xff] %v396_v40  ;;  %v400_v44 = vadd.f32 %v399_v42, %v75_v6  ;;  %v401_v45 = vpop.f32.mrb[15].mxu0  ;;  %v449_v48 = vadd.f32 %v448_v47, %v83_v18  ;;  %v450_v49 = vpop.f32.mrb[13].mxu1 }
 0x109   :  { %700 = vst [vmem:[#allocation5 + $0x118] sm:$0xff] %v398_v41  ;;  %v402_v46 = vadd.f32 %v401_v45, %v79_v10  ;;  %v451_v51 = vadd.f32 %v450_v49, %v87_v21  ;;  %v452_v52 = vpop.f32.mrb[14].mxu1 }
 0x10a   :  { %714 = vst [vmem:[#allocation5 + $0x188] sm:$0xff] %v400_v44  ;;  %701 = vst [vmem:[#allocation5 + $0x120] sm:$0xff] %v449_v48  ;;  %v453_v54 = vadd.f32 %v452_v52, %v83_v18  ;;  %v454_v55 = vpop.f32.mrb[15].mxu1 }
 0x10b   :  { %715 = vst [vmem:[#allocation5 + $0x190] sm:$0xff] %v402_v46  ;;  %702 = vst [vmem:[#allocation5 + $0x128] sm:$0xff] %v451_v51  ;;  %v455_v57 = vadd.f32 %v454_v55, %v87_v21  ;;  %v107_v21 = vrot.slane %v1014_v43, %v74_v60  ;;  %v115_v60 = vrot.slane %v1014_v43, %v82_v7 }
 0x10c   :  { %716 = vst [vmem:[#allocation5 + $0x198] sm:$0xff] %v453_v54 }
 0x10d   :  { %v491_v56 = vpop.f32.mrb[16].mxu0  ;;  %717 = vst [vmem:[#allocation5 + $0x1a0] sm:$0xff] %v455_v57 }
 0x10e   :  { %v492_v58 = vadd.f32 %v491_v56, %v91_v50  ;;  %v493_v59 = vpop.f32.mrb[17].mxu0 }
 0x10f   :  { %v494_v61 = vadd.f32 %v493_v59, %v95_v53  ;;  %v495_v62 = vpop.f32.mrb[18].mxu0  ;;  %v544_v3 = vpop.f32.mrb[16].mxu1 }
 0x110   :  { %673 = vst [vmem:[#allocation5 + $0x40] sm:$0xff] %v492_v58  ;;  %v496_v0 = vadd.f32 %v495_v62, %v91_v50  ;;  %v497_v1 = vpop.f32.mrb[19].mxu0  ;;  %v545_v4 = vadd.f32 %v544_v3, %v99_v32  ;;  %v546_v5 = vpop.f32.mrb[17].mxu1 }
 0x111   :  { %674 = vst [vmem:[#allocation5 + $0x48] sm:$0xff] %v494_v61  ;;  %v498_v2 = vadd.f32 %v497_v1, %v95_v53  ;;  %v547_v6 = vadd.f32 %v546_v5, %v103_v34  ;;  %v548_v8 = vpop.f32.mrb[18].mxu1 }
 0x112   :  { %688 = vst [vmem:[#allocation5 + $0xb8] sm:$0xff] %v496_v0  ;;  %675 = vst [vmem:[#allocation5 + $0x50] sm:$0xff] %v545_v4  ;;  %v549_v36 = vadd.f32 %v548_v8, %v99_v32  ;;  %v550_v9 = vpop.f32.mrb[19].mxu1 }
 0x113   :  { %689 = vst [vmem:[#allocation5 + $0xc0] sm:$0xff] %v498_v2  ;;  %676 = vst [vmem:[#allocation5 + $0x58] sm:$0xff] %v547_v6  ;;  %v551_v11 = vadd.f32 %v550_v9, %v103_v34 }
 0x114   :  { %690 = vst [vmem:[#allocation5 + $0xc8] sm:$0xff] %v549_v36 }
 0x115   :  { %v501_v10 = vpop.f32.mrb[20].mxu0  ;;  %691 = vst [vmem:[#allocation5 + $0xd0] sm:$0xff] %v551_v11 }
 0x116   :  { %v502_v12 = vadd.f32 %v501_v10, %v91_v50  ;;  %v503_v38 = vpop.f32.mrb[21].mxu0 }
 0x117   :  { %v504_v13 = vadd.f32 %v503_v38, %v95_v53  ;;  %v505_v14 = vpop.f32.mrb[22].mxu0  ;;  %v554_v18 = vpop.f32.mrb[20].mxu1 }
 0x118   :  { %703 = vst [vmem:[#allocation5 + $0x130] sm:$0xff] %v502_v12  ;;  %v506_v15 = vadd.f32 %v505_v14, %v91_v50  ;;  %v507_v16 = vpop.f32.mrb[23].mxu0  ;;  %v555_v19 = vadd.f32 %v554_v18, %v99_v32  ;;  %v556_v20 = vpop.f32.mrb[21].mxu1 }
 0x119   :  { %704 = vst [vmem:[#allocation5 + $0x138] sm:$0xff] %v504_v13  ;;  %v508_v17 = vadd.f32 %v507_v16, %v95_v53  ;;  %v557_v22 = vadd.f32 %v556_v20, %v103_v34  ;;  %v558_v23 = vpop.f32.mrb[22].mxu1 }
 0x11a   :  { %718 = vst [vmem:[#allocation5 + $0x1a8] sm:$0xff] %v506_v15  ;;  %705 = vst [vmem:[#allocation5 + $0x140] sm:$0xff] %v555_v19  ;;  %v559_v25 = vadd.f32 %v558_v23, %v99_v32  ;;  %v560_v26 = vpop.f32.mrb[23].mxu1 }
 0x11b   :  { %719 = vst [vmem:[#allocation5 + $0x1b0] sm:$0xff] %v508_v17  ;;  %706 = vst [vmem:[#allocation5 + $0x148] sm:$0xff] %v557_v22  ;;  %v561_v28 = vadd.f32 %v560_v26, %v103_v34 }
 0x11c   :  { %720 = vst [vmem:[#allocation5 + $0x1b8] sm:$0xff] %v559_v25 }
 0x11d   :  { %v597_v27 = vpop.f32.mrb[24].mxu0  ;;  %721 = vst [vmem:[#allocation5 + $0x1c0] sm:$0xff] %v561_v28 }
 0x11e   :  { %v598_v29 = vadd.f32 %v597_v27, %v107_v21  ;;  %v599_v30 = vpop.f32.mrb[25].mxu0 }
 0x11f   :  { %v600_v35 = vadd.f32 %v599_v30, %v111_v24  ;;  %v601_v37 = vpop.f32.mrb[26].mxu0  ;;  %v787_v33 = vpop.f32.mrb[24].mxu1 }
 0x120   :  { %677 = vst [vmem:[#allocation5 + $0x60] sm:$0xff] %v598_v29  ;;  %v602_v39 = vadd.f32 %v601_v37, %v107_v21  ;;  %v603_v40 = vpop.f32.mrb[27].mxu0  ;;  %v659_v41 = vadd.f32 %v787_v33, %v115_v60  ;;  %v650_v42 = vpop.f32.mrb[25].mxu1 }
 0x121   :  { %678 = vst [vmem:[#allocation5 + $0x68] sm:$0xff] %v600_v35  ;;  %v604_v63 = vadd.f32 %v603_v40, %v111_v24  ;;  %v651_v44 = vadd.f32 %v650_v42, %v115_v60  ;;  %v788_v45 = vpop.f32.mrb[26].mxu1 }
 0x122   :  { %692 = vst [vmem:[#allocation5 + $0xd8] sm:$0xff] %v602_v39  ;;  %709 = vst [vmem:[#allocation5 + $0x160] sm:$0xff] %v659_v41  ;;  %v662_v46 = vadd.f32 %v788_v45, %v115_v60  ;;  %v653_v31 = vpop.f32.mrb[27].mxu1 }
 0x123   :  { %693 = vst [vmem:[#allocation5 + $0xe0] sm:$0xff] %v604_v63  ;;  %679 = vst [vmem:[#allocation5 + $0x70] sm:$0xff] %v651_v44  ;;  %v654_v43 = vadd.f32 %v653_v31, %v115_v60 }
 0x124   :  { %724 = vst [vmem:[#allocation5 + $0x1d8] sm:$0xff] %v662_v46 }
 0x125   :  { %v607_v7 = vpop.f32.mrb[28].mxu0  ;;  %694 = vst [vmem:[#allocation5 + $0xe8] sm:$0xff] %v654_v43 }
 0x126   :  { %v608_v47 = vadd.f32 %v607_v7, %v107_v21  ;;  %v609_v48 = vpop.f32.mrb[29].mxu0 }
 0x127   :  { %v610_v49 = vadd.f32 %v609_v48, %v111_v24  ;;  %v611_v50 = vpop.f32.mrb[30].mxu0 }
 0x128   :  { %707 = vst [vmem:[#allocation5 + $0x150] sm:$0xff] %v608_v47  ;;  %v612_v51 = vadd.f32 %v611_v50, %v107_v21  ;;  %v613_v52 = vpop.f32.mrb[31].mxu0 }
 0x129   :  { %708 = vst [vmem:[#allocation5 + $0x158] sm:$0xff] %v610_v49  ;;  %v614_v53 = vadd.f32 %v613_v52, %v111_v24 }
 0x12a   :  { %722 = vst [vmem:[#allocation5 + $0x1c8] sm:$0xff] %v612_v51 }
 0x12b   :  { %723 = vst [vmem:[#allocation5 + $0x1d0] sm:$0xff] %v614_v53 }
 0x12c   :  { %852 = shalt.err (!%p849_p12)
}
 0x12d   :  { %s853_s13 = scalar_lea.hbm %s1052_s3, 7680 }
 0x12e   :  { %p854_p13 = scmp.ne.s32.totalorder %s1052_s3, %s853_s13  ;;  %p857_p0 = scmp.lt.u32.totalorder %s853_s13, %s1052_s3 }
 0x130   :  { %p859_p1 = pnand %p857_p0, %p854_p13 }
 0x132   :  { %862 = shalt.err (!%p859_p1)
}
 0x133   :  { %s872_s18 = smov 1920   ;;  %s873_s19 = smov 120  }
 0x134   :  { %736 = dma.vmem_to_hbm [thread:$0]  %s731_s9, 7680, %s1052_s3, [#allocation4], %s872_s18, %s872_s18, %s873_s19  }
 0x135   :  { %865 = dma.done.wait [#allocation4], 7680  }
 0x136   :  { %866 = vsyncadd [#allocation4], 4294959616 }
 0x137   :  { %740 = vsyncpa [#allocation3], 1 }
 0x138   :  { %741 = vsyncpa [#allocation4], 1 }

</bundles_post_ra>
